<compile_context>
chip_gen: v6e
topology: v6e:2x2x1
jax: 0.10.0
libtpu: 0.0.40
codegen_flags: <defaults>
</compile_context>

<pallas_src>
import math

import jax
import jax.numpy as jnp
from jax.experimental import pallas as pl
from jax.experimental.pallas import tpu as pltpu


def _gelu_new(x):
    # GPT-2 "gelu_new" (tanh approximation), matching HF/PyTorch semantics.
    c = math.sqrt(2.0 / math.pi)
    return 0.5 * x * (1.0 + jnp.tanh(c * (x + 0.044715 * x * x * x)))


def _round_up(a, b):
    return -(-a // b) * b


def _pick_h_tile(H, h_tile):
    """Return (tH, H_pad): tH divides H_pad and is lane-aligned (mult. of 128)
    whenever H > h_tile; H_pad >= H is the (possibly zero-padded) extent."""
    if H <= h_tile:
        return H, H
    start = (h_tile // 128) * 128
    for cand in range(start, 127, -128):
        if H % cand == 0:
            return cand, H
    # No lane-aligned divisor of H: zero-pad H.  Padded columns are inert
    # because gelu(0 + 0) == 0 and the padded rows of W2 are zero.
    H_pad = _round_up(H, 128)
    for cand in range(start, 127, -128):
        if H_pad % cand == 0:
            return cand, H_pad
    return 128, H_pad


def mlp_kernel(x_ref, w1_ref, b1_ref, w2_ref, b2_ref, o_ref, acc_ref):
    """Grid = (seq_tiles, h_tiles). Axis 1 (H chunks) is the reduction axis."""
    hc = pl.program_id(1)

    @pl.when(hc == 0)
    def _init():
        acc_ref[...] = jnp.zeros_like(acc_ref)

    # up-proj chunk on the MXU: [tm, D] @ [D, tH] with f32 accumulation.
    # x arrives already in the weight dtype (cast once in the wrapper).
    h = jnp.dot(x_ref[...], w1_ref[...], preferred_element_type=jnp.float32)
    # bias + gelu_new in f32; tanh goes to the EUP slot (overlaps MXU work).
    h = h + b1_ref[...].astype(jnp.float32)
    h = _gelu_new(h)

    # down-proj chunk accumulated into the resident f32 scratch:
    # [tm, tH] @ [tH, D]
    acc_ref[...] += jnp.dot(h.astype(w2_ref.dtype), w2_ref[...],
                            preferred_element_type=jnp.float32)

    @pl.when(hc == pl.num_programs(1) - 1)
    def _finalize():
        o_ref[...] = (acc_ref[...]
                      + b2_ref[...].astype(jnp.float32)).astype(o_ref.dtype)


def mlp_pallas(x, w_up, b_up, w_down, b_down, *, seq_tile=512, h_tile=512,
               vmem_budget_bytes=40 * 1024 * 1024):
    """x: [S, D]; w_up: [D, H]; b_up: [H]; w_down: [H, D]; b_down: [D]."""
    S, D = x.shape
    Dw, H = w_up.shape
    assert Dw == D and w_down.shape == (H, D)
    assert b_up.shape == (H,) and b_down.shape == (D,)
    out_dtype = x.dtype

    # --- sequence (M) tile: big tiles amortize weight streaming; tiny inputs
    # are zero-padded up to >=128 rows so the MXU never sees row slivers. ---
    if S >= seq_tile:
        tm = seq_tile
    else:
        tm = min(seq_tile, _round_up(max(S, 1), 128))
    S_pad = _round_up(S, tm)

    # --- H (intermediate) tile: lane-aligned chunk dividing the padded H. ---
    tH, H_pad = _pick_h_tile(H, h_tile)

    w_isz = w_up.dtype.itemsize
    b1_isz = b_up.dtype.itemsize
    b2_isz = b_down.dtype.itemsize
    o_isz = x.dtype.itemsize
    x_isz = w_isz  # x is cast to the weight dtype below

    def vmem_bytes(tm_, tH_):
        # Double-buffered input/output tiles + the resident f32 accumulator.
        return (2 * tm_ * D * x_isz            # x tile
                + 2 * D * tH_ * w_isz          # W1 chunk
                + 2 * tH_ * D * w_isz          # W2 chunk
                + 2 * tH_ * b1_isz             # b1 chunk
                + 2 * D * b2_isz               # b2
                + 2 * tm_ * D * o_isz          # out tile
                + tm_ * D * 4)                 # f32 accumulator scratch

    if vmem_bytes(tm, H_pad) <= vmem_budget_bytes:
        # Full weight set fits: collapse the H axis so the weight block index
        # never changes and W1/W2 are DMA'd from HBM exactly once per call.
        tH = H_pad
    else:
        # Streamed weights: shrink tiles until the footprint fits the budget.
        while vmem_bytes(tm, tH) > vmem_budget_bytes and (tH > 128 or tm > 128):
            if tH > 128:
                tH, H_pad = _pick_h_tile(H, max(128, tH // 2))
            else:
                tm = max(128, tm // 2)
                S_pad = _round_up(S, tm)

    # --- zero-pad ragged extents.  Padded rows compute garbage that is sliced
    # off at the end; padded H columns are inert (gelu(0)=0, zero W2 rows). ---
    x_in = x
    if S_pad != S:
        x_in = jnp.pad(x_in, ((0, S_pad - S), (0, 0)))
    # Cast activations to the weight dtype ONCE here (not per H chunk inside
    # the kernel): removes redundant per-step VALU work and halves x DMA for
    # bf16 weights.
    x_in = x_in.astype(w_up.dtype)

    if H_pad != H:
        w_up = jnp.pad(w_up, ((0, 0), (0, H_pad - H)))
        b_up = jnp.pad(b_up, (0, H_pad - H))
        w_down = jnp.pad(w_down, ((0, H_pad - H), (0, 0)))

    b_up2 = b_up.reshape(1, H_pad)
    b_down2 = b_down.reshape(1, D)

    n_seq_tiles = S_pad // tm
    grid = (n_seq_tiles, H_pad // tH)

    # --- cost estimate reflecting real HBM traffic: weights are re-streamed
    # once per sequence tile unless they are VMEM-resident. ---
    weight_streams = 1 if tH == H_pad else n_seq_tiles
    flops = 4 * S_pad * D * H_pad              # two matmuls, 2 flops per MAC
    transcendentals = S_pad * H_pad            # one tanh per intermediate elem
    bytes_accessed = int(
        S_pad * D * x_isz
        + weight_streams * (D * H_pad + H_pad * D) * w_isz
        + H_pad * b1_isz + D * b2_isz
        + S_pad * D * o_isz)

    # Explicit scoped-VMEM limit from the actual tile footprint, capped below
    # v7x's 64 MiB physical VMEM (v5e/v6e have 128 MiB, so this is safe there).
    vmem_limit = int(min(max(vmem_bytes(tm, tH) * 5 // 4 + (2 << 20), 32 << 20),
                         46 << 20))

    out = pl.pallas_call(
        mlp_kernel,
        out_shape=jax.ShapeDtypeStruct((S_pad, D), out_dtype),
        grid_spec=pltpu.PrefetchScalarGridSpec(
            num_scalar_prefetch=0,
            grid=grid,
            in_specs=[
                pl.BlockSpec((tm, D), lambda i, h: (i, 0)),   # x tile (resident over H)
                pl.BlockSpec((D, tH), lambda i, h: (0, h)),   # up-proj weight chunk
                pl.BlockSpec((1, tH), lambda i, h: (0, h)),   # up-proj bias chunk
                pl.BlockSpec((tH, D), lambda i, h: (h, 0)),   # down-proj weight chunk
                pl.BlockSpec((1, D), lambda i, h: (0, 0)),    # down-proj bias
            ],
            out_specs=pl.BlockSpec((tm, D), lambda i, h: (i, 0)),
            scratch_shapes=[pltpu.VMEM((tm, D), jnp.float32)],
        ),
        compiler_params=pltpu.CompilerParams(
            dimension_semantics=("parallel", "arbitrary"),
            vmem_limit_bytes=vmem_limit,
        ),
        cost_estimate=pl.CostEstimate(
            flops=flops,
            transcendentals=transcendentals,
            bytes_accessed=bytes_accessed,
        ),
    )(x_in, w_up, b_up2, w_down, b_down2)

    return out[:S] if S_pad != S else out


def init_linear(key, in_features, out_features, dtype=jnp.float32):
    """Deterministic init mimicking PyTorch nn.Linear (uniform +/- 1/sqrt(in))."""
    kw, kb = jax.random.split(key)
    bound = 1.0 / math.sqrt(in_features)
    # PyTorch stores weight as [out, in]; return the [in, out] transpose so the
    # kernel computes x @ W directly.
    w = jax.random.uniform(kw, (out_features, in_features), jnp.float32, -bound, bound)
    b = jax.random.uniform(kb, (out_features,), jnp.float32, -bound, bound)
    return w.T.astype(dtype), b.astype(dtype)


if __name__ == "__main__":
    # Small GPT-2-like config: seq_length=8, n_embd=32 -> intermediate=128.
    seq_length = 8
    n_embd = 32
    n_inner = 4 * n_embd

    key = jax.random.PRNGKey(0)
    kx, k1, k2 = jax.random.split(key, 3)

    x = jax.random.normal(kx, (seq_length, n_embd), dtype=jnp.float32)
    # Weights stored as bf16 (halves DMA/VMEM); all accumulation stays in f32.
    w_up, b_up = init_linear(k1, n_embd, n_inner, dtype=jnp.bfloat16)
    w_down, b_down = init_linear(k2, n_inner, n_embd, dtype=jnp.bfloat16)

    out = mlp_pallas(x, w_up, b_up, w_down, b_down)
    out = jax.block_until_ready(out)

    # Pure-JAX reference replicating the kernel's cast points (bf16 matmul
    # operands, f32 accumulation + f32 activation).  Matches a full-f32
    # PyTorch Mlp to ~1e-3 given the bf16 operand casts.
    h = jnp.dot(x.astype(jnp.bfloat16), w_up, preferred_element_type=jnp.float32)
    h = _gelu_new(h + b_up.astype(jnp.float32))
    ref = jnp.dot(h.astype(jnp.bfloat16), w_down, preferred_element_type=jnp.float32)
    ref = (ref + b_down.astype(jnp.float32)).astype(x.dtype)

    assert out.shape == (seq_length, n_embd)
    assert jnp.allclose(out, ref, atol=2e-3, rtol=2e-3), "mismatch vs reference"

    print("KERNEL_OK")
</pallas_src>

<mosaic_0001>
module attributes {stable_mosaic.version = 11 : i64} {
  func.func @mlp_kernel(%arg0: i32, %arg1: i32, %arg2: memref<128x32xbf16, #tpu.memory_space<vmem>>, %arg3: memref<32x128xbf16, #tpu.memory_space<vmem>>, %arg4: memref<1x128xbf16, #tpu.memory_space<vmem>>, %arg5: memref<128x32xbf16, #tpu.memory_space<vmem>>, %arg6: memref<1x32xbf16, #tpu.memory_space<vmem>>, %arg7: memref<128x32xf32, #tpu.memory_space<vmem>>, %arg8: memref<128x32xf32, #tpu.memory_space<vmem>>) attributes {dimension_semantics = [#tpu.dimension_semantics<parallel>, #tpu.dimension_semantics<arbitrary>], iteration_bounds = array<i64: 1, 1>, scalar_prefetch = 0 : i64, scratch_operands = 1 : i64, tpu.core_type = #tpu.core_type<tc>, window_params = [{transform_indices = @transform_0, window_bounds = array<i64: 128, 32>}, {transform_indices = @transform_1, window_bounds = array<i64: 32, 128>}, {transform_indices = @transform_2, window_bounds = array<i64: 1, 128>}, {transform_indices = @transform_3, window_bounds = array<i64: 128, 32>}, {pipeline_mode = #tpu.pipeline_mode<synchronous>, transform_indices = @transform_4, window_bounds = array<i64: 1, 32>}, {transform_indices = @transform_5, window_bounds = array<i64: 128, 32>}]} {
    %c0_i32 = arith.constant 0 : i32
    %0 = arith.cmpi eq, %arg1, %c0_i32 : i32
    %1 = arith.extui %0 : i1 to i32
    %c0_i32_0 = arith.constant 0 : i32
    %2 = arith.cmpi ne, %1, %c0_i32_0 : i32
    scf.if %2 {
      %cst_19 = arith.constant 0.000000e+00 : f32
      %32 = vector.broadcast %cst_19 : f32 to vector<128x32xf32>
      %c0_20 = arith.constant 0 : index
      %c0_21 = arith.constant 0 : index
      %33 = vector.load %arg8[%c0_20, %c0_21] : memref<128x32xf32, #tpu.memory_space<vmem>>, vector<128x32xf32>
      tpu.vector_store %arg8[%c0_20, %c0_21], %32 {strides = array<i32>} : memref<128x32xf32, #tpu.memory_space<vmem>>, vector<128x32xf32>,
    } else {
    }
    %c0 = arith.constant 0 : index
    %c0_1 = arith.constant 0 : index
    %3 = vector.load %arg2[%c0, %c0_1] : memref<128x32xbf16, #tpu.memory_space<vmem>>, vector<128x32xbf16>
    %c0_2 = arith.constant 0 : index
    %c0_3 = arith.constant 0 : index
    %4 = vector.load %arg3[%c0_2, %c0_3] : memref<32x128xbf16, #tpu.memory_space<vmem>>, vector<32x128xbf16>
    %cst = arith.constant dense<0.000000e+00> : vector<128x128xf32>
    %5 = tpu.matmul %3, %4, %cst {dimension_numbers = #tpu.dot_dimension_numbers<[1], [0], [0], [1], [0, 0, 1, 1], [], []>} : vector<128x32xbf16>, vector<32x128xbf16>, vector<128x128xf32> -> vector<128x128xf32>
    %c0_4 = arith.constant 0 : index
    %c0_5 = arith.constant 0 : index
    %6 = vector.load %arg4[%c0_4, %c0_5] : memref<1x128xbf16, #tpu.memory_space<vmem>>, vector<1x128xbf16>
    %7 = arith.extf %6 : vector<1x128xbf16> to vector<1x128xf32>
    %8 = vector.broadcast %7 : vector<1x128xf32> to vector<128x128xf32>
    %9 = arith.addf %5, %8 : vector<128x128xf32>
    %cst_6 = arith.constant 5.000000e-01 : f32
    %10 = vector.broadcast %cst_6 : f32 to vector<128x128xf32>
    %11 = arith.mulf %10, %9 : vector<128x128xf32>
    %cst_7 = arith.constant 4.471500e-02 : f32
    %12 = vector.broadcast %cst_7 : f32 to vector<128x128xf32>
    %13 = arith.mulf %12, %9 : vector<128x128xf32>
    %14 = arith.mulf %13, %9 : vector<128x128xf32>
    %15 = arith.mulf %14, %9 : vector<128x128xf32>
    %16 = arith.addf %9, %15 : vector<128x128xf32>
    %cst_8 = arith.constant 0.797884583 : f32
    %17 = vector.broadcast %cst_8 : f32 to vector<128x128xf32>
    %18 = arith.mulf %17, %16 : vector<128x128xf32>
    %19 = math.tanh %18 : vector<128x128xf32>
    %cst_9 = arith.constant 1.000000e+00 : f32
    %20 = vector.broadcast %cst_9 : f32 to vector<128x128xf32>
    %21 = arith.addf %20, %19 : vector<128x128xf32>
    %22 = arith.mulf %11, %21 : vector<128x128xf32>
    %c0_10 = arith.constant 0 : index
    %c0_11 = arith.constant 0 : index
    %23 = vector.load %arg8[%c0_10, %c0_11] : memref<128x32xf32, #tpu.memory_space<vmem>>, vector<128x32xf32>
    %24 = arith.truncf %22 : vector<128x128xf32> to vector<128x128xbf16>
    %c0_12 = arith.constant 0 : index
    %c0_13 = arith.constant 0 : index
    %25 = vector.load %arg5[%c0_12, %c0_13] : memref<128x32xbf16, #tpu.memory_space<vmem>>, vector<128x32xbf16>
    %cst_14 = arith.constant dense<0.000000e+00> : vector<128x32xf32>
    %26 = tpu.matmul %24, %25, %cst_14 {dimension_numbers = #tpu.dot_dimension_numbers<[1], [0], [0], [1], [0, 0, 1, 1], [], []>} : vector<128x128xbf16>, vector<128x32xbf16>, vector<128x32xf32> -> vector<128x32xf32>
    %27 = arith.addf %23, %26 : vector<128x32xf32>
    %c0_15 = arith.constant 0 : index
    %c0_16 = arith.constant 0 : index
    %28 = vector.load %arg8[%c0_15, %c0_16] : memref<128x32xf32, #tpu.memory_space<vmem>>, vector<128x32xf32>
    tpu.vector_store %arg8[%c0_15, %c0_16], %27 {strides = array<i32>} : memref<128x32xf32, #tpu.memory_space<vmem>>, vector<128x32xf32>,
    %c0_i32_17 = arith.constant 0 : i32
    %29 = arith.cmpi eq, %arg1, %c0_i32_17 : i32
    %30 = arith.extui %29 : i1 to i32
    %c0_i32_18 = arith.constant 0 : i32
    %31 = arith.cmpi ne, %30, %c0_i32_18 : i32
    scf.if %31 {
      %c0_19 = arith.constant 0 : index
      %c0_20 = arith.constant 0 : index
      %32 = vector.load %arg8[%c0_19, %c0_20] : memref<128x32xf32, #tpu.memory_space<vmem>>, vector<128x32xf32>
      %c0_21 = arith.constant 0 : index
      %c0_22 = arith.constant 0 : index
      %33 = vector.load %arg6[%c0_21, %c0_22] : memref<1x32xbf16, #tpu.memory_space<vmem>>, vector<1x32xbf16>
      %34 = arith.extf %33 : vector<1x32xbf16> to vector<1x32xf32>
      %35 = vector.broadcast %34 : vector<1x32xf32> to vector<128x32xf32>
      %36 = arith.addf %32, %35 : vector<128x32xf32>
      %c0_23 = arith.constant 0 : index
      %c0_24 = arith.constant 0 : index
      %37 = vector.load %arg7[%c0_23, %c0_24] : memref<128x32xf32, #tpu.memory_space<vmem>>, vector<128x32xf32>
      tpu.vector_store %arg7[%c0_23, %c0_24], %36 {strides = array<i32>} : memref<128x32xf32, #tpu.memory_space<vmem>>, vector<128x32xf32>,
    } else {
    }
    return
  }
  func.func @transform_0(%arg0: i32, %arg1: i32) -> (i32, i32) {
    %c0_i32 = arith.constant 0 : i32
    %c0_i32_0 = arith.constant 0 : i32
    return %arg0, %c0_i32 : i32, i32
  }
  func.func @transform_1(%arg0: i32, %arg1: i32) -> (i32, i32) {
    %c0_i32 = arith.constant 0 : i32
    %c0_i32_0 = arith.constant 0 : i32
    return %c0_i32, %arg1 : i32, i32
  }
  func.func @transform_2(%arg0: i32, %arg1: i32) -> (i32, i32) {
    %c0_i32 = arith.constant 0 : i32
    %c0_i32_0 = arith.constant 0 : i32
    return %c0_i32, %arg1 : i32, i32
  }
  func.func @transform_3(%arg0: i32, %arg1: i32) -> (i32, i32) {
    %c0_i32 = arith.constant 0 : i32
    %c0_i32_0 = arith.constant 0 : i32
    return %arg1, %c0_i32 : i32, i32
  }
  func.func @transform_4(%arg0: i32, %arg1: i32) -> (i32, i32) {
    %c0_i32 = arith.constant 0 : i32
    %c0_i32_0 = arith.constant 0 : i32
    %c0_i32_1 = arith.constant 0 : i32
    return %c0_i32, %c0_i32_0 : i32, i32
  }
  func.func @transform_5(%arg0: i32, %arg1: i32) -> (i32, i32) {
    %c0_i32 = arith.constant 0 : i32
    %c0_i32_0 = arith.constant 0 : i32
    return %arg0, %c0_i32 : i32, i32
  }
}

</mosaic_0001>

<bundles_post_ra>
// kernel: tpu_custom_call.1
= control target key start
LH: loop header
LB: loop body
LE: loop exit
PB: predicated region body
PF: predicated region fallthrough
CT: control target
= control target key end

     0   :  { %vm25_vm0 = vcmask 261120   ;;  %v835_v18 = vmov 0.0   ;;  %v64_v19 = vlaneseq  ;;  %s1185_s1 = inlined_call_operand.vmem [shape: bf16[32,128], index: 1, kind: input, shape index: {}]   ;;  %s1186_s0 = inlined_call_operand.vmem [shape: bf16[128,32], index: 0, kind: input, shape index: {}]   ;;  %s1187_s3 = inlined_call_operand.vmem [shape: bf16[128,32], index: 3, kind: input, shape index: {}]   ;;  %s1188_s2 = inlined_call_operand.vmem [shape: bf16[1,128], index: 2, kind: input, shape index: {}]   ;;  %s1189_s4 = inlined_call_operand.vmem [shape: bf16[1,32], index: 4, kind: input, shape index: {}]   ;;  %s1190_s5 = inlined_call_operand.vmem [shape: f32[128,32], index: 5, kind: output, shape index: {}]  }
   0x1   :  { %v785_v0 = vld [vmem:[%s1185_s1 + $0x8] sm:$0xff]   ;;  %v786_v1 = vld [vmem:[%s1185_s1] sm:$0xff]   ;;  %v789_v4 = vld [vmem:[%s1186_s0 + $0x10] sm:$0xff]   ;;  %28 = vst.msk [vmem:[#allocation2 + $0x10] sm:$0xff] %vm25_vm0, %v835_v18 }
   0x2   :  { %716 = vmatprep.subr.bf16.mxu0 %v785_v0  ;;  %v787_v2 = vld [vmem:[%s1186_s0] sm:$0xff]   ;;  %v788_v3 = vld [vmem:[%s1186_s0 + $0x8] sm:$0xff]   ;;  %v790_v5 = vld [vmem:[%s1186_s0 + $0x18] sm:$0xff]   ;;  %26 = vst.msk [vmem:[#allocation2] sm:$0xff] %vm25_vm0, %v835_v18  ;;  %v944_v20 = vshrl.u32 %v64_v19, 7 }
   0x3   :  { %717 = vmatpush3.bf16.msra.mxu0 %v785_v0  ;;  %720 = vmatprep.mubr.msk.bf16.mxu0 %vm25_vm0, %v787_v2  ;;  %v791_v6 = vld [vmem:[%s1186_s0 + $0x20] sm:$0xff]   ;;  %v792_v7 = vld [vmem:[%s1186_s0 + $0x28] sm:$0xff]   ;;  %v793_v8 = vld [vmem:[%s1186_s0 + $0x30] sm:$0xff]   ;;  %27 = vst.msk [vmem:[#allocation2 + $0x8] sm:$0xff] %vm25_vm0, %v835_v18 }
   0x4   :  { %718 = vmatprep.subr.bf16.mxu0 %v786_v1  ;;  %v794_v9 = vld [vmem:[%s1186_s0 + $0x38] sm:$0xff]   ;;  %v796_v11 = vld [vmem:[%s1187_s3 + $0x30] sm:$0xff]   ;;  %v797_v12 = vld [vmem:[%s1187_s3 + $0x28] sm:$0xff]   ;;  %29 = vst.msk [vmem:[#allocation2 + $0x18] sm:$0xff] %vm25_vm0, %v835_v18  ;;  %v66_v23 = vsub.s32 0, %v944_v20 }
   0x5   :  { %v795_v10 = vld [vmem:[%s1187_s3 + $0x38] sm:$0xff]   ;;  %v798_v13 = vld [vmem:[%s1187_s3 + $0x20] sm:$0xff]   ;;  %v800_v15 = vld [vmem:[%s1187_s3 + $0x10] sm:$0xff]   ;;  %30 = vst.msk [vmem:[#allocation2 + $0x20] sm:$0xff] %vm25_vm0, %v835_v18 }
   0x6   :  { %768 = vmatprep.subr.bf16.mxu1 %v795_v10  ;;  %v799_v14 = vld [vmem:[%s1187_s3 + $0x18] sm:$0xff]   ;;  %v801_v16 = vld [vmem:[%s1187_s3 + $0x8] sm:$0xff]   ;;  %v802_v17 = vld [vmem:[%s1187_s3] sm:$0xff]   ;;  %31 = vst.msk [vmem:[#allocation2 + $0x28] sm:$0xff] %vm25_vm0, %v835_v18 }
   0x7   :  { %719 = vmatpush3.bf16.msra.mxu0 %v786_v1  ;;  %776 = vmatpush3.bf16.msra.mxu1 %v795_v10  ;;  %32 = vst.msk [vmem:[#allocation2 + $0x30] sm:$0xff] %vm25_vm0, %v835_v18  ;;  %33 = vst.msk [vmem:[#allocation2 + $0x38] sm:$0xff] %vm25_vm0, %v835_v18  ;;  %v62_v21 = vld [vmem:[%s1188_s2] sm:$0x1] }
   0x8   :  { %736 = vmatprep.subr.bf16.mxu0 %v795_v10  ;;  %769 = vmatprep.subr.bf16.mxu1 %v796_v11  ;;  %34 = vst.msk [vmem:[#allocation2 + $0x40] sm:$0xff] %vm25_vm0, %v835_v18  ;;  %35 = vst.msk [vmem:[#allocation2 + $0x48] sm:$0xff] %vm25_vm0, %v835_v18  ;;  %v63_v22 = vunpack.c.l.bf16 %v62_v21 }
   0x9   :  { %36 = vst.msk [vmem:[#allocation2 + $0x50] sm:$0xff] %vm25_vm0, %v835_v18  ;;  %37 = vst.msk [vmem:[#allocation2 + $0x58] sm:$0xff] %vm25_vm0, %v835_v18 }
   0xa   :  { %721 = vmatmul.mubr.msk.bf16.vlgmr.msra.gmra.mxu0 %vm25_vm0, %v788_v3  ;;  %38 = vst.msk [vmem:[#allocation2 + $0x60] sm:$0xff] %vm25_vm0, %v835_v18  ;;  %39 = vst.msk [vmem:[#allocation2 + $0x68] sm:$0xff] %vm25_vm0, %v835_v18  ;;  %v952_v24 = vrot.slane %v63_v22, %v66_v23 }
   0xb   :  { %724 = vmatprep.mubr.msk.bf16.mxu0 %vm25_vm0, %v789_v4  ;;  %737 = vmatpush3.bf16.msra.mxu0 %v795_v10  ;;  %40 = vst.msk [vmem:[#allocation2 + $0x70] sm:$0xff] %vm25_vm0, %v835_v18  ;;  %41 = vst.msk [vmem:[#allocation2 + $0x78] sm:$0xff] %vm25_vm0, %v835_v18 }
   0xc   :  { %738 = vmatprep.subr.bf16.mxu0 %v796_v11  ;;  %777 = vmatpush3.bf16.msra.mxu1 %v796_v11 }
   0xd   :  { %770 = vmatprep.subr.bf16.mxu1 %v797_v12 }
   0xf   :  { %739 = vmatpush3.bf16.msra.mxu0 %v796_v11 }
  0x10   :  { %740 = vmatprep.subr.bf16.mxu0 %v797_v12  ;;  %778 = vmatpush3.bf16.msra.mxu1 %v797_v12 }
  0x11   :  { %771 = vmatprep.subr.bf16.mxu1 %v798_v13 }
  0x12   :  { %725 = vmatmul.mubr.msk.bf16.gmra.mxu0 %vm25_vm0, %v790_v5 }
  0x13   :  { %728 = vmatprep.mubr.msk.bf16.mxu0 %vm25_vm0, %v791_v6  ;;  %741 = vmatpush3.bf16.msra.mxu0 %v797_v12 }
  0x14   :  { %742 = vmatprep.subr.bf16.mxu0 %v798_v13  ;;  %779 = vmatpush3.bf16.msra.mxu1 %v798_v13 }
  0x15   :  { %772 = vmatprep.subr.bf16.mxu1 %v799_v14 }
  0x17   :  { %743 = vmatpush3.bf16.msra.mxu0 %v798_v13 }
  0x18   :  { %744 = vmatprep.subr.bf16.mxu0 %v799_v14  ;;  %780 = vmatpush3.bf16.msra.mxu1 %v799_v14 }
  0x19   :  { %773 = vmatprep.subr.bf16.mxu1 %v800_v15 }
  0x1a   :  { %729 = vmatmul.mubr.msk.bf16.gmra.mxu0 %vm25_vm0, %v792_v7 }
  0x1b   :  { %732 = vmatprep.mubr.msk.bf16.mxu0 %vm25_vm0, %v793_v8  ;;  %745 = vmatpush3.bf16.msra.mxu0 %v799_v14 }
  0x1c   :  { %746 = vmatprep.subr.bf16.mxu0 %v800_v15  ;;  %781 = vmatpush3.bf16.msra.mxu1 %v800_v15 }
  0x1d   :  { %774 = vmatprep.subr.bf16.mxu1 %v801_v16 }
  0x1f   :  { %747 = vmatpush3.bf16.msra.mxu0 %v800_v15 }
  0x20   :  { %748 = vmatprep.subr.bf16.mxu0 %v801_v16  ;;  %782 = vmatpush3.bf16.msra.mxu1 %v801_v16 }
  0x21   :  { %775 = vmatprep.subr.bf16.mxu1 %v802_v17 }
  0x22   :  { %733 = vmatmul.mubr.msk.bf16.gmra.mxu0 %vm25_vm0, %v794_v9 }
  0x23   :  { %749 = vmatpush3.bf16.msra.mxu0 %v801_v16 }
  0x24   :  { %750 = vmatprep.subr.bf16.mxu0 %v802_v17  ;;  %783 = vmatpush3.bf16.msra.mxu1 %v802_v17 }
  0x27   :  { %751 = vmatpush3.bf16.msra.mxu0 %v802_v17 }
  0xca   :  { %v722_v25 = vpop.f32.mrf.mxu0 }
  0xcb   :  { %v955_v26 = vadd.f32 %v722_v25, %v952_v24 }
  0xcc   :  { %v179_v27 = vpop.f32.mrf.mxu0 }
  0xcd   :  { %v260_v28 = vmul.f32 0.044715, %v955_v26  ;;  %v959_v29 = vadd.f32 %v179_v27, %v952_v24 }
  0xce   :  { %v723_v30 = vpop.f32.mrf.mxu0 }
  0xcf   :  { %v276_v31 = vmul.f32 %v260_v28, %v955_v26  ;;  %v258_v32 = vmul.f32 0.044715, %v959_v29  ;;  %v964_v33 = vadd.f32 %v723_v30, %v952_v24 }
  0xd0   :  { %v182_v34 = vpop.f32.mrf.mxu0 }
  0xd1   :  { %v292_v35 = vmul.f32 %v276_v31, %v955_v26  ;;  %v274_v36 = vmul.f32 %v258_v32, %v959_v29  ;;  %v261_v37 = vmul.f32 0.044715, %v964_v33  ;;  %v970_v38 = vadd.f32 %v182_v34, %v952_v24 }
  0xd2   :  { %v726_v39 = vpop.f32.mrf.mxu0 }
  0xd3   :  { %v308_v40 = vadd.f32 %v292_v35, %v955_v26  ;;  %v290_v41 = vmul.f32 %v274_v36, %v959_v29  ;;  %v277_v42 = vmul.f32 %v261_v37, %v964_v33  ;;  %v976_v43 = vadd.f32 %v726_v39, %v952_v24 }
  0xd4   :  { %v259_v44 = vmul.f32 0.044715, %v970_v38  ;;  %v195_v45 = vpop.f32.mrf.mxu0 }
  0xd5   :  { %v324_v46 = vmul.f32 0.7978846, %v308_v40  ;;  %v293_v47 = vmul.f32 %v277_v42, %v964_v33  ;;  %v264_v48 = vmul.f32 0.044715, %v976_v43  ;;  %v982_v49 = vadd.f32 %v195_v45, %v952_v24 }
  0xd6   :  { %v275_v50 = vmul.f32 %v259_v44, %v970_v38  ;;  %v727_v51 = vpop.f32.mrf.mxu0  ;;  %v306_v52 = vadd.f32 %v290_v41, %v959_v29  ;;  %v244_v42 = vmul.f32 0.5, %v955_v26  ;;  %v242_v26 = vmul.f32 0.5, %v959_v29 }
  0xd7   :  { %v309_v53 = vadd.f32 %v293_v47, %v964_v33  ;;  %v280_v54 = vmul.f32 %v264_v48, %v976_v43  ;;  %v262_v55 = vmul.f32 0.044715, %v982_v49  ;;  %803 = vtanh.f32 %v324_v46 }
  0xd8   :  { %v291_v56 = vmul.f32 %v275_v50, %v970_v38  ;;  %v991_v57 = vadd.f32 %v727_v51, %v952_v24  ;;  %v198_v58 = vpop.f32.mrf.mxu0  ;;  %v322_v59 = vmul.f32 0.7978846, %v306_v52 }
  0xd9   :  { %v325_v60 = vmul.f32 0.7978846, %v309_v53  ;;  %v296_v61 = vmul.f32 %v280_v54, %v976_v43  ;;  %v995_v62 = vadd.f32 %v198_v58, %v952_v24  ;;  %v278_v63 = vmul.f32 %v262_v55, %v982_v49 }
  0xda   :  { %v265_v0 = vmul.f32 0.044715, %v991_v57  ;;  %v730_v1 = vpop.f32.mrf.mxu0  ;;  %v307_v2 = vadd.f32 %v291_v56, %v970_v38  ;;  %805 = vtanh.f32 %v322_v59  ;;  %v245_v53 = vmul.f32 0.5, %v964_v33 }
  0xdb   :  { %807 = vtanh.f32 %v325_v60  ;;  %v263_v3 = vmul.f32 0.044715, %v995_v62  ;;  %v1002_v4 = vadd.f32 %v730_v1, %v952_v24  ;;  %v294_v8 = vmul.f32 %v278_v63, %v982_v49 }
  0xdc   :  { %v281_v5 = vmul.f32 %v265_v0, %v991_v57  ;;  %v211_v6 = vpop.f32.mrf.mxu0  ;;  %v323_v7 = vmul.f32 0.7978846, %v307_v2  ;;  %v312_v9 = vadd.f32 %v296_v61, %v976_v43  ;;  %v243_v61 = vmul.f32 0.5, %v970_v38 }
  0xdd   :  { %v268_v10 = vmul.f32 0.044715, %v1002_v4  ;;  %v1009_v11 = vadd.f32 %v211_v6, %v952_v24  ;;  %v279_v12 = vmul.f32 %v263_v3, %v995_v62  ;;  %v310_v15 = vadd.f32 %v294_v8, %v982_v49 }
  0xde   :  { %v297_v13 = vmul.f32 %v281_v5, %v991_v57  ;;  %v731_v14 = vpop.f32.mrf.mxu0  ;;  %809 = vtanh.f32 %v323_v7  ;;  %v328_v16 = vmul.f32 0.7978846, %v312_v9 }
  0xdf   :  { %v284_v17 = vmul.f32 %v268_v10, %v1002_v4  ;;  %v266_v18 = vmul.f32 0.044715, %v1009_v11  ;;  %v1017_v19 = vadd.f32 %v731_v14, %v952_v24  ;;  %v295_v21 = vmul.f32 %v279_v12, %v995_v62 }
  0xe0   :  { %v214_v22 = vpop.f32.mrf.mxu0  ;;  %v326_v25 = vmul.f32 0.7978846, %v310_v15  ;;  %v313_v27 = vadd.f32 %v297_v13, %v991_v57  ;;  %811 = vtanh.f32 %v328_v16 }
  0xe1   :  { %v300_v28 = vmul.f32 %v284_v17, %v1002_v4  ;;  %v282_v30 = vmul.f32 %v266_v18, %v1009_v11  ;;  %v269_v31 = vmul.f32 0.044715, %v1017_v19  ;;  %v1025_v32 = vadd.f32 %v214_v22, %v952_v24 }
  0xe2   :  { %v734_v34 = vpop.f32.mrf.mxu0  ;;  %v311_v35 = vadd.f32 %v295_v21, %v995_v62  ;;  %813 = vtanh.f32 %v326_v25  ;;  %v329_v36 = vmul.f32 0.7978846, %v313_v27 }
  0xe3   :  { %v298_v37 = vmul.f32 %v282_v30, %v1009_v11  ;;  %v285_v39 = vmul.f32 %v269_v31, %v1017_v19  ;;  %v267_v40 = vmul.f32 0.044715, %v1025_v32  ;;  %v1032_v41 = vadd.f32 %v734_v34, %v952_v24 }
  0xe4   :  { %v227_v44 = vpop.f32.mrf.mxu0  ;;  %v327_v45 = vmul.f32 0.7978846, %v311_v35  ;;  %815 = vtanh.f32 %v329_v36  ;;  %v316_v46 = vadd.f32 %v300_v28, %v1002_v4  ;;  %v804_v47 = vpop.eup %803 }
  0xe5   :  { %v301_v48 = vmul.f32 %v285_v39, %v1017_v19  ;;  %v283_v50 = vmul.f32 %v267_v40, %v1025_v32  ;;  %v272_v51 = vmul.f32 0.044715, %v1032_v41  ;;  %v1040_v52 = vadd.f32 %v227_v44, %v952_v24 }
  0xe6   :  { %v735_v54 = vpop.f32.mrf.mxu0  ;;  %817 = vtanh.f32 %v327_v45  ;;  %v314_v55 = vadd.f32 %v298_v37, %v1009_v11  ;;  %v356_v1 = vadd.f32 1.0, %v804_v47  ;;  %v332_v29 = vmul.f32 0.7978846, %v316_v46 }
  0xe7   :  { %v806_v56 = vpop.eup %805  ;;  %v299_v58 = vmul.f32 %v283_v50, %v1025_v32  ;;  %v270_v59 = vmul.f32 0.044715, %v1040_v52  ;;  %v1048_v60 = vadd.f32 %v735_v54, %v952_v24  ;;  %v317_v2 = vadd.f32 %v301_v48, %v1017_v19 }
  0xe8   :  { %v808_v63 = vpop.eup %807  ;;  %v230_v0 = vpop.f32.mrf.mxu0  ;;  %v330_v33 = vmul.f32 0.7978846, %v314_v55  ;;  %v288_v3 = vmul.f32 %v272_v51, %v1032_v41  ;;  %v354_v8 = vadd.f32 1.0, %v806_v56  ;;  %v372_v30 = vmul.f32 %v356_v1, %v244_v42 }
  0xe9   :  { %v286_v5 = vmul.f32 %v270_v59, %v1040_v52  ;;  %v273_v6 = vmul.f32 0.044715, %v1048_v60  ;;  %v1056_v7 = vadd.f32 %v230_v0, %v952_v24  ;;  %v357_v9 = vadd.f32 1.0, %v808_v63 }
  0xea   :  { %v315_v38 = vadd.f32 %v299_v58, %v1025_v32  ;;  %819 = vtanh.f32 %v330_v33  ;;  %v333_v15 = vmul.f32 0.7978846, %v317_v2  ;;  %v304_v24 = vmul.f32 %v288_v3, %v1032_v41 }
  0xeb   :  { %v810_v10 = vpop.eup %809  ;;  %v302_v12 = vmul.f32 %v286_v5, %v1040_v52  ;;  %v289_v13 = vmul.f32 %v273_v6, %v1048_v60  ;;  %v271_v14 = vmul.f32 0.044715, %v1056_v7  ;;  %v373_v17 = vmul.f32 %v357_v9, %v245_v53 }
  0xec   :  { %v355_v16 = vadd.f32 1.0, %v810_v10  ;;  %v331_v18 = vmul.f32 0.7978846, %v315_v38  ;;  %821 = vtanh.f32 %v332_v29  ;;  %v370_v27 = vmul.f32 %v354_v8, %v242_v26 }
  0xed   :  { %v812_v21 = vpop.eup %811  ;;  %v305_v22 = vmul.f32 %v289_v13, %v1048_v60  ;;  %v287_v25 = vmul.f32 %v271_v14, %v1056_v7  ;;  %823 = vtanh.f32 %v333_v15  ;;  %v318_v35 = vadd.f32 %v302_v12, %v1040_v52 }
  0xee   :  { %v371_v28 = vmul.f32 %v355_v16, %v243_v61  ;;  %825 = vtanh.f32 %v331_v18  ;;  %v403_v37 = vpack.c.bf16 %v373_v17, %v372_v30  ;;  %v320_v45 = vadd.f32 %v304_v24, %v1032_v41 }
  0xef   :  { %v814_v31 = vpop.eup %813  ;;  %v303_v34 = vmul.f32 %v287_v25, %v1056_v7  ;;  %v334_v44 = vmul.f32 0.7978846, %v318_v35  ;;  %v321_v46 = vadd.f32 %v305_v22, %v1048_v60  ;;  %v249_v42 = vmul.f32 0.5, %v991_v57 }
  0xf0   :  { %v402_v36 = vpack.c.bf16 %v371_v28, %v370_v27  ;;  %v358_v47 = vadd.f32 1.0, %v814_v31  ;;  %v360_v48 = vadd.f32 1.0, %v812_v21  ;;  %v336_v54 = vmul.f32 0.7978846, %v320_v45 }
  0xf1   :  { %v816_v39 = vpop.eup %815  ;;  %v319_v40 = vadd.f32 %v303_v34, %v1056_v7  ;;  %827 = vtanh.f32 %v334_v44  ;;  %v337_v26 = vmul.f32 0.7978846, %v321_v46  ;;  %v246_v55 = vmul.f32 0.5, %v982_v49  ;;  %v386_v44 = vld [vmem:[#allocation2] sm:$0xff]  ;;  %v389_v46 = vld [vmem:[#allocation2 + $0x18] sm:$0xff] }
  0xf2   :  { %752 = vmatprep.mubr.bf16.mxu0 %v402_v36  ;;  %v361_v50 = vadd.f32 1.0, %v816_v39  ;;  %v247_v56 = vmul.f32 0.5, %v995_v62  ;;  %v248_v59 = vmul.f32 0.5, %v976_v43  ;;  %v253_v62 = vmul.f32 0.5, %v1017_v19 }
  0xf3   :  { %v818_v51 = vpop.eup %817  ;;  %753 = vmatmul.mubr.bf16.vlgmr.msra.gmra.mxu0 %v403_v37  ;;  %v335_v53 = vmul.f32 0.7978846, %v319_v40  ;;  %v374_v63 = vmul.f32 %v358_v47, %v246_v55  ;;  %v250_v8 = vmul.f32 0.5, %v1009_v11  ;;  %v251_v9 = vmul.f32 0.5, %v1025_v32  ;;  %v388_v40 = vld [vmem:[#allocation2 + $0x10] sm:$0xff] }
  0xf4   :  { %v359_v58 = vadd.f32 1.0, %v818_v51  ;;  %v377_v61 = vmul.f32 %v361_v50, %v249_v42  ;;  %v376_v1 = vmul.f32 %v360_v48, %v248_v59  ;;  %v252_v10 = vmul.f32 0.5, %v1002_v4  ;;  %v387_v48 = vld [vmem:[#allocation2 + $0x8] sm:$0xff] }
  0xf5   :  { %829 = vtanh.f32 %v335_v53  ;;  %v254_v22 = vmul.f32 0.5, %v1040_v52  ;;  %v255_v11 = vmul.f32 0.5, %v1056_v7  ;;  %v256_v4 = vmul.f32 0.5, %v1032_v41  ;;  %v622_v52 = vld [vmem:[%s1189_s4] sm:$0x1]  ;;  %v392_v53 = vld [vmem:[#allocation2 + $0x30] sm:$0xff] }
  0xf6   :  { %v375_v0 = vmul.f32 %v359_v58, %v247_v56  ;;  %831 = vtanh.f32 %v336_v54  ;;  %v405_v29 = vpack.c.bf16 %v377_v61, %v376_v1  ;;  %v257_v31 = vmul.f32 0.5, %v1048_v60  ;;  %v390_v56 = vld [vmem:[#allocation2 + $0x20] sm:$0xff] }
  0xf7   :  { %v820_v57 = vpop.eup %819  ;;  %833 = vtanh.f32 %v337_v26  ;;  %v623_v47 = vunpack.c.l.bf16 %v622_v52 }
  0xf8   :  { %v404_v33 = vpack.c.bf16 %v375_v0, %v374_v63  ;;  %v362_v5 = vadd.f32 1.0, %v820_v57  ;;  %v393_v63 = vld [vmem:[#allocation2 + $0x38] sm:$0xff] }
  0xf9   :  { %v822_v2 = vpop.eup %821  ;;  %v1089_v54 = vrot.slane %v623_v47, %v66_v23  ;;  %v391_v23 = vld [vmem:[#allocation2 + $0x28] sm:$0xff] }
  0xfa   :  { %v824_v3 = vpop.eup %823  ;;  %756 = vmatprep.mubr.bf16.mxu1 %v404_v33  ;;  %v364_v6 = vadd.f32 1.0, %v822_v2  ;;  %v378_v13 = vmul.f32 %v362_v5, %v250_v8  ;;  %v396_v5 = vld [vmem:[#allocation2 + $0x50] sm:$0xff]  ;;  %v394_v8 = vld [vmem:[#allocation2 + $0x40] sm:$0xff] }
  0xfb   :  { %v826_v49 = vpop.eup %825  ;;  %757 = vmatmul.mubr.bf16.vlgmr.msra.gmra.mxu1 %v405_v29  ;;  %v365_v43 = vadd.f32 1.0, %v824_v3 }
  0xfc   :  { %v363_v38 = vadd.f32 1.0, %v826_v49  ;;  %v380_v15 = vmul.f32 %v364_v6, %v252_v10 }
  0xfd   :  { %v381_v12 = vmul.f32 %v365_v43, %v253_v62 }
  0xfe   :  { %v379_v14 = vmul.f32 %v363_v38, %v251_v9  ;;  %v828_v16 = vpop.eup %827 }
  0xff   :  { %v407_v18 = vpack.c.bf16 %v381_v12, %v380_v15  ;;  %v366_v21 = vadd.f32 1.0, %v828_v16 }
 0x100   :  { %v406_v17 = vpack.c.bf16 %v379_v14, %v378_v13  ;;  %v397_v13 = vld [vmem:[#allocation2 + $0x58] sm:$0xff] }
 0x101   :  { %v382_v28 = vmul.f32 %v366_v21, %v254_v22 }
 0x102   :  { %v830_v24 = vpop.eup %829  ;;  %760 = vmatprep.mubr.bf16.mxu1 %v406_v17 }
 0x103   :  { %v832_v19 = vpop.eup %831  ;;  %761 = vmatmul.mubr.bf16.gmra.mxu1 %v407_v18  ;;  %v367_v32 = vadd.f32 1.0, %v830_v24  ;;  %v395_v18 = vld [vmem:[#allocation2 + $0x48] sm:$0xff] }
 0x104   :  { %v834_v25 = vpop.eup %833  ;;  %v368_v27 = vadd.f32 1.0, %v832_v19 }
 0x105   :  { %v383_v30 = vmul.f32 %v367_v32, %v255_v11  ;;  %v369_v34 = vadd.f32 1.0, %v834_v25  ;;  %v400_v11 = vld [vmem:[#allocation2 + $0x70] sm:$0xff] }
 0x106   :  { %v384_v36 = vmul.f32 %v368_v27, %v256_v4 }
 0x107   :  { %v408_v35 = vpack.c.bf16 %v383_v30, %v382_v28  ;;  %v385_v37 = vmul.f32 %v369_v34, %v257_v31  ;;  %v398_v28 = vld [vmem:[#allocation2 + $0x60] sm:$0xff] }
 0x109   :  { %764 = vmatprep.mubr.bf16.mxu1 %v408_v35  ;;  %v409_v39 = vpack.c.bf16 %v385_v37, %v384_v36  ;;  %v401_v36 = vld [vmem:[#allocation2 + $0x78] sm:$0xff] }
 0x10b   :  { %765 = vmatmul.mubr.bf16.gmra.mxu1 %v409_v39 }
 0x1b3   :  { %v754_v7 = vpop.f32.mrf.mxu0 }
 0x1b4   :  { %v573_v41 = vadd.f32 %v754_v7, %v388_v40  ;;  %v399_v7 = vld [vmem:[#allocation2 + $0x68] sm:$0xff] }
 0x1b5   :  { %v508_v45 = vpop.f32.mrf.mxu0 }
 0x1b6   :  { %589 = vst.msk [vmem:[#allocation2 + $0x10] sm:$0xff] %vm25_vm0, %v573_v41  ;;  %v571_v60 = vadd.f32 %v508_v45, %v386_v44 }
 0x1b7   :  { %v755_v42 = vpop.f32.mrf.mxu0 }
 0x1b8   :  { %587 = vst.msk [vmem:[#allocation2] sm:$0xff] %vm25_vm0, %v571_v60  ;;  %v574_v50 = vadd.f32 %v755_v42, %v389_v46 }
 0x1b9   :  { %v511_v51 = vpop.f32.mrf.mxu0 }
 0x1ba   :  { %590 = vst.msk [vmem:[#allocation2 + $0x18] sm:$0xff] %vm25_vm0, %v574_v50  ;;  %v572_v26 = vadd.f32 %v511_v51, %v387_v48 }
 0x1bb   :  { %v758_v55 = vpop.f32.mrf.mxu1 }
 0x1bc   :  { %588 = vst.msk [vmem:[#allocation2 + $0x8] sm:$0xff] %vm25_vm0, %v572_v26  ;;  %v577_v58 = vadd.f32 %v758_v55, %v392_v53 }
 0x1bd   :  { %v608_v59 = vld [vmem:[#allocation2 + $0x10] sm:$0xff]  ;;  %v524_v61 = vpop.f32.mrf.mxu1 }
 0x1be   :  { %v630_v0 = vadd.f32 %v1089_v54, %v608_v59  ;;  %593 = vst.msk [vmem:[#allocation2 + $0x30] sm:$0xff] %vm25_vm0, %v577_v58  ;;  %v575_v57 = vadd.f32 %v524_v61, %v390_v56 }
 0x1bf   :  { %v606_v1 = vld [vmem:[#allocation2] sm:$0xff]  ;;  %v759_v20 = vpop.f32.mrf.mxu1 }
 0x1c0   :  { %646 = vst.msk [vmem:[%s1190_s5 + $0x10] sm:$0xff] %vm25_vm0, %v630_v0  ;;  %v628_v33 = vadd.f32 %v1089_v54, %v606_v1  ;;  %591 = vst.msk [vmem:[#allocation2 + $0x20] sm:$0xff] %vm25_vm0, %v575_v57  ;;  %v578_v2 = vadd.f32 %v759_v20, %v393_v63 }
 0x1c1   :  { %v609_v29 = vld [vmem:[#allocation2 + $0x18] sm:$0xff]  ;;  %v527_v3 = vpop.f32.mrf.mxu1 }
 0x1c2   :  { %644 = vst.msk [vmem:[%s1190_s5] sm:$0xff] %vm25_vm0, %v628_v33  ;;  %v631_v49 = vadd.f32 %v1089_v54, %v609_v29  ;;  %594 = vst.msk [vmem:[#allocation2 + $0x38] sm:$0xff] %vm25_vm0, %v578_v2  ;;  %v576_v62 = vadd.f32 %v527_v3, %v391_v23 }
 0x1c3   :  { %v607_v6 = vld [vmem:[#allocation2 + $0x8] sm:$0xff]  ;;  %v762_v43 = vpop.f32.mrf.mxu1 }
 0x1c4   :  { %647 = vst.msk [vmem:[%s1190_s5 + $0x18] sm:$0xff] %vm25_vm0, %v631_v49  ;;  %v629_v9 = vadd.f32 %v1089_v54, %v607_v6  ;;  %592 = vst.msk [vmem:[#allocation2 + $0x28] sm:$0xff] %vm25_vm0, %v576_v62  ;;  %v581_v38 = vadd.f32 %v762_v43, %v396_v5 }
 0x1c5   :  { %v612_v10 = vld [vmem:[#allocation2 + $0x30] sm:$0xff]  ;;  %v540_v12 = vpop.f32.mrf.mxu1 }
 0x1c6   :  { %645 = vst.msk [vmem:[%s1190_s5 + $0x8] sm:$0xff] %vm25_vm0, %v629_v9  ;;  %v634_v14 = vadd.f32 %v1089_v54, %v612_v10  ;;  %597 = vst.msk [vmem:[#allocation2 + $0x50] sm:$0xff] %vm25_vm0, %v581_v38  ;;  %v579_v15 = vadd.f32 %v540_v12, %v394_v8 }
 0x1c7   :  { %v610_v16 = vld [vmem:[#allocation2 + $0x20] sm:$0xff]  ;;  %v763_v17 = vpop.f32.mrf.mxu1 }
 0x1c8   :  { %650 = vst.msk [vmem:[%s1190_s5 + $0x30] sm:$0xff] %vm25_vm0, %v634_v14  ;;  %v632_v21 = vadd.f32 %v1089_v54, %v610_v16  ;;  %595 = vst.msk [vmem:[#allocation2 + $0x40] sm:$0xff] %vm25_vm0, %v579_v15  ;;  %v582_v24 = vadd.f32 %v763_v17, %v397_v13 }
 0x1c9   :  { %v613_v19 = vld [vmem:[#allocation2 + $0x38] sm:$0xff]  ;;  %v543_v22 = vpop.f32.mrf.mxu1 }
 0x1ca   :  { %648 = vst.msk [vmem:[%s1190_s5 + $0x20] sm:$0xff] %vm25_vm0, %v632_v21  ;;  %v635_v32 = vadd.f32 %v1089_v54, %v613_v19  ;;  %598 = vst.msk [vmem:[#allocation2 + $0x58] sm:$0xff] %vm25_vm0, %v582_v24  ;;  %v580_v25 = vadd.f32 %v543_v22, %v395_v18 }
 0x1cb   :  { %v611_v4 = vld [vmem:[#allocation2 + $0x28] sm:$0xff]  ;;  %v766_v27 = vpop.f32.mrf.mxu1 }
 0x1cc   :  { %651 = vst.msk [vmem:[%s1190_s5 + $0x38] sm:$0xff] %vm25_vm0, %v635_v32  ;;  %v633_v30 = vadd.f32 %v1089_v54, %v611_v4  ;;  %596 = vst.msk [vmem:[#allocation2 + $0x48] sm:$0xff] %vm25_vm0, %v580_v25  ;;  %v585_v31 = vadd.f32 %v766_v27, %v400_v11 }
 0x1cd   :  { %v616_v34 = vld [vmem:[#allocation2 + $0x50] sm:$0xff]  ;;  %v556_v35 = vpop.f32.mrf.mxu1 }
 0x1ce   :  { %649 = vst.msk [vmem:[%s1190_s5 + $0x28] sm:$0xff] %vm25_vm0, %v633_v30  ;;  %v638_v37 = vadd.f32 %v1089_v54, %v616_v34  ;;  %601 = vst.msk [vmem:[#allocation2 + $0x70] sm:$0xff] %vm25_vm0, %v585_v31  ;;  %v583_v39 = vadd.f32 %v556_v35, %v398_v28 }
 0x1cf   :  { %v614_v40 = vld [vmem:[#allocation2 + $0x40] sm:$0xff]  ;;  %v767_v52 = vpop.f32.mrf.mxu1 }
 0x1d0   :  { %654 = vst.msk [vmem:[%s1190_s5 + $0x50] sm:$0xff] %vm25_vm0, %v638_v37  ;;  %v636_v44 = vadd.f32 %v1089_v54, %v614_v40  ;;  %599 = vst.msk [vmem:[#allocation2 + $0x60] sm:$0xff] %vm25_vm0, %v583_v39  ;;  %v586_v41 = vadd.f32 %v767_v52, %v401_v36 }
 0x1d1   :  { %v617_v45 = vld [vmem:[#allocation2 + $0x58] sm:$0xff]  ;;  %v559_v46 = vpop.f32.mrf.mxu1 }
 0x1d2   :  { %652 = vst.msk [vmem:[%s1190_s5 + $0x40] sm:$0xff] %vm25_vm0, %v636_v44  ;;  %v639_v47 = vadd.f32 %v1089_v54, %v617_v45  ;;  %602 = vst.msk [vmem:[#allocation2 + $0x78] sm:$0xff] %vm25_vm0, %v586_v41  ;;  %v584_v60 = vadd.f32 %v559_v46, %v399_v7 }
 0x1d3   :  { %v615_v42 = vld [vmem:[#allocation2 + $0x48] sm:$0xff] }
 0x1d4   :  { %655 = vst.msk [vmem:[%s1190_s5 + $0x58] sm:$0xff] %vm25_vm0, %v639_v47  ;;  %v637_v48 = vadd.f32 %v1089_v54, %v615_v42  ;;  %600 = vst.msk [vmem:[#allocation2 + $0x68] sm:$0xff] %vm25_vm0, %v584_v60 }
 0x1d5   :  { %v620_v50 = vld [vmem:[#allocation2 + $0x70] sm:$0xff] }
 0x1d6   :  { %653 = vst.msk [vmem:[%s1190_s5 + $0x48] sm:$0xff] %vm25_vm0, %v637_v48  ;;  %v642_v51 = vadd.f32 %v1089_v54, %v620_v50 }
 0x1d7   :  { %v618_v53 = vld [vmem:[#allocation2 + $0x60] sm:$0xff] }
 0x1d8   :  { %658 = vst.msk [vmem:[%s1190_s5 + $0x70] sm:$0xff] %vm25_vm0, %v642_v51  ;;  %v640_v26 = vadd.f32 %v1089_v54, %v618_v53 }
 0x1d9   :  { %v621_v55 = vld [vmem:[#allocation2 + $0x78] sm:$0xff] }
 0x1da   :  { %656 = vst.msk [vmem:[%s1190_s5 + $0x60] sm:$0xff] %vm25_vm0, %v640_v26  ;;  %v643_v56 = vadd.f32 %v1089_v54, %v621_v55 }
 0x1db   :  { %v619_v58 = vld [vmem:[#allocation2 + $0x68] sm:$0xff] }
 0x1dc   :  { %659 = vst.msk [vmem:[%s1190_s5 + $0x78] sm:$0xff] %vm25_vm0, %v643_v56  ;;  %v641_v59 = vadd.f32 %v1089_v54, %v619_v58 }
 0x1de   :  { %657 = vst.msk [vmem:[%s1190_s5 + $0x68] sm:$0xff] %vm25_vm0, %v641_v59 }

</bundles_post_ra>
